<compile_context>
chip_gen: v7x
topology: tpu7x:2x2x1
jax: 0.10.0
libtpu: 0.0.40
codegen_flags: <defaults>
</compile_context>

<pallas_src>
import jax
import jax.numpy as jnp
from jax.experimental import pallas as pl
from jax.experimental.pallas import tpu as pltpu

HIDDEN = 128
LANE = 128
NEG_BIG = -1e30  # padded-logit bias; kept in f32 so exp() underflows to exactly 0


def _round_up(x, m):
    return ((x + m - 1) // m) * m


def qnet_kernel(x_ref, w1_ref, b1_ref, w2_ref, b2_ref, out_ref):
    # x_ref  : (TILE_B, K_pad)    compute dtype (bf16 or f32)
    # w1_ref : (K_pad, 128)       compute dtype
    # b1_ref : (1, 128)           f32
    # w2_ref : (128, OUT_PAD)     compute dtype (padded cols are zero)
    # b2_ref : (1, OUT_PAD)       f32 (padded cols are NEG_BIG -> softmax ignores them)
    # out_ref: (TILE_B, NUM_OUT)  f32 -- only the valid output lanes are stored
    h = jnp.dot(x_ref[...], w1_ref[...],
                preferred_element_type=jnp.float32) + b1_ref[...]
    h = jnp.maximum(h, 0.0)

    logits = jnp.dot(h.astype(w2_ref.dtype), w2_ref[...],
                     preferred_element_type=jnp.float32) + b2_ref[...]

    # numerically stable softmax on the lane-dense padded slab (in-register)
    m = jnp.max(logits, axis=-1, keepdims=True)
    e = jnp.exp(logits - m)
    denom = jnp.sum(e, axis=-1, keepdims=True)

    # exact divide (approx reciprocal biased the categorical probabilities);
    # store only the valid output lanes -> no padded-slab HBM writeback.
    n_out = out_ref.shape[-1]
    out_ref[...] = (e[:, :n_out] / denom).astype(out_ref.dtype)


def pack_qnet_params(w1, b1, w2, b2, *, compute_dtype=jnp.bfloat16):
    """One-time packing/padding of QNet params (hoisted out of the per-step path)."""
    K, H = w1.shape
    assert H == HIDDEN
    H2, num_outputs = w2.shape
    assert H2 == HIDDEN

    sub = 16 if compute_dtype == jnp.bfloat16 else 8      # bf16 packs 2 rows/sublane
    k_pad = max(_round_up(K, sub), sub)
    out_pad = max(_round_up(num_outputs, LANE), LANE)      # lane-dense fc2 slab

    w1_p = jnp.zeros((k_pad, HIDDEN), compute_dtype).at[:K, :].set(
        w1.astype(compute_dtype))
    b1_p = jnp.reshape(b1, (1, HIDDEN)).astype(jnp.float32)
    w2_p = jnp.zeros((HIDDEN, out_pad), compute_dtype).at[:, :num_outputs].set(
        w2.astype(compute_dtype))
    # padded columns get a huge negative bias (f32!) so exp() is exactly 0 there
    b2_p = jnp.full((1, out_pad), NEG_BIG, jnp.float32).at[0, :num_outputs].set(
        jnp.reshape(b2, (-1,)).astype(jnp.float32))

    return dict(w1=w1_p, b1=b1_p, w2=w2_p, b2=b2_p,
                num_inputs=K, num_outputs=num_outputs,
                k_pad=k_pad, out_pad=out_pad, sub=sub,
                compute_dtype=compute_dtype)


def qnet_forward(x, packed, *, tile_b=1024):
    """policy = softmax(relu(x @ w1 + b1) @ w2 + b2) in one Pallas kernel."""
    B, K = x.shape
    assert K == packed["num_inputs"]
    num_outputs = packed["num_outputs"]
    k_pad = packed["k_pad"]
    out_pad = packed["out_pad"]
    sub = packed["sub"]
    cdt = packed["compute_dtype"]

    # Batch tile: large to amortize ~0.35us/step overhead, but when B is large
    # choose tb so grid_b >= 2 and the "parallel" axis can use both v7x cores.
    if B >= 2 * sub:
        tb = min(_round_up(tile_b, sub), _round_up(-(-B // 2), sub))
    else:
        tb = _round_up(max(B, 1), sub)
    tb = max(sub, tb)
    b_pad = _round_up(B, tb)
    grid_b = b_pad // tb

    # Only pad/cast x when actually needed (avoids an extra full pass over x).
    if (B, K) == (b_pad, k_pad) and x.dtype == cdt:
        x_p = x
    else:
        x_p = jnp.zeros((b_pad, k_pad), cdt).at[:B, :K].set(x.astype(cdt))

    out = pl.pallas_call(
        qnet_kernel,
        out_shape=jax.ShapeDtypeStruct((b_pad, num_outputs), jnp.float32),
        grid_spec=pltpu.PrefetchScalarGridSpec(
            num_scalar_prefetch=0,
            grid=(grid_b,),
            in_specs=[
                pl.BlockSpec((tb, k_pad), lambda i: (i, 0)),          # x: batch-tiled
                pl.BlockSpec((k_pad, HIDDEN), lambda i: (0, 0)),      # w1: resident
                pl.BlockSpec((1, HIDDEN), lambda i: (0, 0)),          # b1: resident
                pl.BlockSpec((HIDDEN, out_pad), lambda i: (0, 0)),    # w2: resident
                pl.BlockSpec((1, out_pad), lambda i: (0, 0)),         # b2: resident
            ],
            out_specs=pl.BlockSpec((tb, num_outputs), lambda i: (i, 0)),
        ),
        compiler_params=pltpu.CompilerParams(
            dimension_semantics=("parallel",),
        ),
    )(x_p, packed["w1"], packed["b1"], packed["w2"], packed["b2"])

    return out if b_pad == B else out[:B]


def xavier_uniform(key, fan_in, fan_out, dtype=jnp.float32):
    # matches torch.nn.init.xavier_uniform (gain=1)
    limit = jnp.sqrt(6.0 / (fan_in + fan_out))
    return jax.random.uniform(key, (fan_in, fan_out), dtype, minval=-limit, maxval=limit)


def init_qnet_params(key, num_inputs, num_outputs, hidden=HIDDEN):
    k1, k2, k3, k4 = jax.random.split(key, 4)
    w1 = xavier_uniform(k1, num_inputs, hidden)
    w2 = xavier_uniform(k2, hidden, num_outputs)
    # biases: PyTorch Linear default init U(-1/sqrt(fan_in), 1/sqrt(fan_in))
    b1 = jax.random.uniform(k3, (1, hidden), jnp.float32,
                            minval=-1.0 / jnp.sqrt(num_inputs),
                            maxval=1.0 / jnp.sqrt(num_inputs))
    b2 = jax.random.uniform(k4, (1, num_outputs), jnp.float32,
                            minval=-1.0 / jnp.sqrt(hidden),
                            maxval=1.0 / jnp.sqrt(hidden))
    return w1, b1, w2, b2


if __name__ == "__main__":
    # Small CartPole-like shapes: 4 observations -> 2 actions, batch of 8.
    batch, num_inputs, num_outputs = 8, 4, 2

    key = jax.random.PRNGKey(0)
    k_x, k_p = jax.random.split(key)
    x = jax.random.normal(k_x, (batch, num_inputs), jnp.float32)
    w1, b1, w2, b2 = init_qnet_params(k_p, num_inputs, num_outputs)

    # pure-JAX reference
    ref = jax.nn.softmax(jnp.maximum(x @ w1 + b1, 0.0) @ w2 + b2, axis=-1)

    # NOTE (perf review): for tiny RL batches like B=8 a plain fused-XLA path is
    # faster than any kernel; the Pallas path pays off once env steps are batched.
    # We still exercise the kernel here for correctness.

    # f32 compute path (tightest numerics)
    packed_f32 = pack_qnet_params(w1, b1, w2, b2, compute_dtype=jnp.float32)
    policy = jax.block_until_ready(qnet_forward(x, packed_f32))
    assert policy.shape == (batch, num_outputs)
    assert jnp.allclose(policy, ref, atol=5e-3, rtol=5e-3)
    assert jnp.allclose(jnp.sum(policy, axis=-1), 1.0, atol=1e-4)   # exact divide

    # default bf16 matmul path (halved DMA bytes, full MXU rate on v6e/v7x)
    packed_bf16 = pack_qnet_params(w1, b1, w2, b2)
    policy_bf16 = jax.block_until_ready(qnet_forward(x, packed_bf16))
    assert policy_bf16.shape == (batch, num_outputs)
    assert jnp.allclose(policy_bf16, ref, atol=5e-2, rtol=5e-2)
    assert jnp.allclose(jnp.sum(policy_bf16, axis=-1), 1.0, atol=1e-3)

    print("KERNEL_OK")
</pallas_src>

<mosaic_0001>
module attributes {stable_mosaic.version = 11 : i64} {
  func.func @qnet_kernel(%arg0: i32, %arg1: memref<8x8xf32, #tpu.memory_space<vmem>>, %arg2: memref<8x128xf32, #tpu.memory_space<vmem>>, %arg3: memref<1x128xf32, #tpu.memory_space<vmem>>, %arg4: memref<128x128xf32, #tpu.memory_space<vmem>>, %arg5: memref<1x128xf32, #tpu.memory_space<vmem>>, %arg6: memref<8x2xf32, #tpu.memory_space<vmem>>) attributes {dimension_semantics = [#tpu.dimension_semantics<parallel>], iteration_bounds = array<i64: 1>, scalar_prefetch = 0 : i64, scratch_operands = 0 : i64, tpu.core_type = #tpu.core_type<tc>, window_params = [{transform_indices = @transform_0, window_bounds = array<i64: 8, 8>}, {pipeline_mode = #tpu.pipeline_mode<synchronous>, transform_indices = @transform_1, window_bounds = array<i64: 8, 128>}, {pipeline_mode = #tpu.pipeline_mode<synchronous>, transform_indices = @transform_2, window_bounds = array<i64: 1, 128>}, {pipeline_mode = #tpu.pipeline_mode<synchronous>, transform_indices = @transform_3, window_bounds = array<i64: 128, 128>}, {pipeline_mode = #tpu.pipeline_mode<synchronous>, transform_indices = @transform_4, window_bounds = array<i64: 1, 128>}, {transform_indices = @transform_5, window_bounds = array<i64: 8, 2>}]} {
    %c0 = arith.constant 0 : index
    %c0_0 = arith.constant 0 : index
    %0 = vector.load %arg1[%c0, %c0_0] : memref<8x8xf32, #tpu.memory_space<vmem>>, vector<8x8xf32>
    %c0_1 = arith.constant 0 : index
    %c0_2 = arith.constant 0 : index
    %1 = vector.load %arg2[%c0_1, %c0_2] : memref<8x128xf32, #tpu.memory_space<vmem>>, vector<8x128xf32>
    %cst = arith.constant dense<0.000000e+00> : vector<8x128xf32>
    %2 = tpu.matmul %0, %1, %cst {dimension_numbers = #tpu.dot_dimension_numbers<[1], [0], [0], [1], [0, 0, 1, 1], [], []>} : vector<8x8xf32>, vector<8x128xf32>, vector<8x128xf32> -> vector<8x128xf32>
    %c0_3 = arith.constant 0 : index
    %c0_4 = arith.constant 0 : index
    %3 = vector.load %arg3[%c0_3, %c0_4] : memref<1x128xf32, #tpu.memory_space<vmem>>, vector<1x128xf32>
    %4 = vector.broadcast %3 : vector<1x128xf32> to vector<8x128xf32>
    %5 = arith.addf %2, %4 : vector<8x128xf32>
    %cst_5 = arith.constant 0.000000e+00 : f32
    %6 = vector.broadcast %cst_5 : f32 to vector<8x128xf32>
    %7 = arith.maximumf %5, %6 : vector<8x128xf32>
    %c0_6 = arith.constant 0 : index
    %c0_7 = arith.constant 0 : index
    %8 = vector.load %arg4[%c0_6, %c0_7] : memref<128x128xf32, #tpu.memory_space<vmem>>, vector<128x128xf32>
    %cst_8 = arith.constant dense<0.000000e+00> : vector<8x128xf32>
    %9 = tpu.matmul %7, %8, %cst_8 {dimension_numbers = #tpu.dot_dimension_numbers<[1], [0], [0], [1], [0, 0, 1, 1], [], []>} : vector<8x128xf32>, vector<128x128xf32>, vector<8x128xf32> -> vector<8x128xf32>
    %c0_9 = arith.constant 0 : index
    %c0_10 = arith.constant 0 : index
    %10 = vector.load %arg5[%c0_9, %c0_10] : memref<1x128xf32, #tpu.memory_space<vmem>>, vector<1x128xf32>
    %11 = vector.broadcast %10 : vector<1x128xf32> to vector<8x128xf32>
    %12 = arith.addf %9, %11 : vector<8x128xf32>
    %cst_11 = arith.constant dense<0xFF800000> : vector<8xf32>
    %13 = vector.multi_reduction <maximumf>, %12, %cst_11 [1] : vector<8x128xf32> to vector<8xf32>
    %14 = vector.shape_cast %13 : vector<8xf32> to vector<8x1xf32>
    %15 = vector.broadcast %14 : vector<8x1xf32> to vector<8x128xf32>
    %16 = arith.subf %12, %15 : vector<8x128xf32>
    %17 = math.exp %16 : vector<8x128xf32>
    %cst_12 = arith.constant dense<0.000000e+00> : vector<8xf32>
    %18 = vector.multi_reduction <add>, %17, %cst_12 [1] : vector<8x128xf32> to vector<8xf32>
    %19 = vector.shape_cast %18 : vector<8xf32> to vector<8x1xf32>
    %20 = vector.extract_strided_slice %17 {offsets = [0, 0], sizes = [8, 2], strides = [1, 1]} : vector<8x128xf32> to vector<8x2xf32>
    %21 = vector.broadcast %19 : vector<8x1xf32> to vector<8x2xf32>
    %22 = arith.divf %20, %21 : vector<8x2xf32>
    %c0_13 = arith.constant 0 : index
    %c0_14 = arith.constant 0 : index
    %23 = vector.load %arg6[%c0_13, %c0_14] : memref<8x2xf32, #tpu.memory_space<vmem>>, vector<8x2xf32>
    tpu.vector_store %arg6[%c0_13, %c0_14], %22 {strides = array<i32>} : memref<8x2xf32, #tpu.memory_space<vmem>>, vector<8x2xf32>,
    return
  }
  func.func @transform_0(%arg0: i32) -> (i32, i32) {
    %c0_i32 = arith.constant 0 : i32
    %c0_i32_0 = arith.constant 0 : i32
    return %arg0, %c0_i32 : i32, i32
  }
  func.func @transform_1(%arg0: i32) -> (i32, i32) {
    %c0_i32 = arith.constant 0 : i32
    %c0_i32_0 = arith.constant 0 : i32
    %c0_i32_1 = arith.constant 0 : i32
    return %c0_i32, %c0_i32_0 : i32, i32
  }
  func.func @transform_2(%arg0: i32) -> (i32, i32) {
    %c0_i32 = arith.constant 0 : i32
    %c0_i32_0 = arith.constant 0 : i32
    %c0_i32_1 = arith.constant 0 : i32
    return %c0_i32, %c0_i32_0 : i32, i32
  }
  func.func @transform_3(%arg0: i32) -> (i32, i32) {
    %c0_i32 = arith.constant 0 : i32
    %c0_i32_0 = arith.constant 0 : i32
    %c0_i32_1 = arith.constant 0 : i32
    return %c0_i32, %c0_i32_0 : i32, i32
  }
  func.func @transform_4(%arg0: i32) -> (i32, i32) {
    %c0_i32 = arith.constant 0 : i32
    %c0_i32_0 = arith.constant 0 : i32
    %c0_i32_1 = arith.constant 0 : i32
    return %c0_i32, %c0_i32_0 : i32, i32
  }
  func.func @transform_5(%arg0: i32) -> (i32, i32) {
    %c0_i32 = arith.constant 0 : i32
    %c0_i32_0 = arith.constant 0 : i32
    return %arg0, %c0_i32 : i32, i32
  }
}

</mosaic_0001>

<bundles_post_ra>
// kernel: tpu_custom_call.1
= control target key start
LH: loop header
LB: loop body
LE: loop exit
PB: predicated region body
PF: predicated region fallthrough
CT: control target
= control target key end

     0   :  { %10 = vsyncpa [#allocation3], 0  ;;  %s502_s0 = inlined_call_operand.hbm [shape: f32[8,8], index: 0, kind: input, shape index: {}]   ;;  %s503_s1 = inlined_call_operand.hbm [shape: f32[8,128], index: 1, kind: input, shape index: {}]   ;;  %s504_s2 = inlined_call_operand.vmem [shape: f32[1,128], index: 2, kind: input, shape index: {}]   ;;  %s505_s3 = inlined_call_operand.hbm [shape: f32[128,128], index: 3, kind: input, shape index: {}]   ;;  %s506_s4 = inlined_call_operand.vmem [shape: f32[1,128], index: 4, kind: input, shape index: {}]   ;;  %s507_s5 = inlined_call_operand.vmem [shape: f32[8,2], index: 5, kind: output, shape index: {}]  }
   0x1   :  { %11 = vsyncpa [#allocation5], 0  ;;  %s419_s18 = smov [#allocation4]   ;;  %s420_s20 = smov [#allocation2]  }
   0x2   :  { %s28_s19 = sshll.u32 %s419_s18, 4  ;;  %s18_s21 = sshll.u32 %s420_s20, 4  ;;  %s29_s19 = int_to_ptr.vmem [resolvable:$true] %s28_s19  ;;  %s19_s21 = int_to_ptr.vmem [resolvable:$true] %s18_s21 }
   0x3   :  { %s349_s24 = scalar_lea.hbm %s503_s1, 128 }
   0x4   :  { %p350_p0 = scmp.ne.s32.totalorder %s503_s1, %s349_s24  ;;  %p353_p1 = scmp.lt.u32.totalorder %s349_s24, %s503_s1 }
   0x6   :  { %p355_p2 = pnand %p353_p1, %p350_p0 }
   0x8   :  { %358 = shalt.err (!%p355_p2)
}
   0x9   :  { %s359_s29 = scalar_lea.vmem %s29_s19, 128  ;;  %p364_p4 = scmp.lt.s32.totalorder %s29_s19, %s29_s19 }
   0xa   :  { %p360_p3 = scmp.ne.s32.totalorder %s29_s19, %s359_s29  ;;  %p365_p5 = scmp.lt.s32.totalorder %s359_s29, %s359_s29 }
   0xc   :  { %p366_p6 = por %p365_p5, %p364_p4 }
   0xe   :  { %p367_p7 = pnand %p366_p6, %p360_p3 }
  0x10   :  { %370 = shalt.err (!%p367_p7)
}
  0x11   :  { %31 = dma.hbm_to_vmem [thread:$0]  %s503_s1, 128, %s29_s19, [#allocation5]  }
  0x12   :  { %s371_s9 = scalar_lea.hbm %s502_s0, 128 }
  0x13   :  { %p372_p8 = scmp.ne.s32.totalorder %s502_s0, %s371_s9  ;;  %p375_p9 = scmp.lt.u32.totalorder %s371_s9, %s502_s0 }
  0x15   :  { %p377_p10 = pnand %p375_p9, %p372_p8 }
  0x17   :  { %380 = shalt.err (!%p377_p10)
}
  0x18   :  { %s381_s14 = scalar_lea.vmem %s19_s21, 128  ;;  %p386_p12 = scmp.lt.s32.totalorder %s19_s21, %s19_s21 }
  0x19   :  { %p382_p11 = scmp.ne.s32.totalorder %s19_s21, %s381_s14  ;;  %p387_p13 = scmp.lt.s32.totalorder %s381_s14, %s381_s14 }
  0x1b   :  { %p388_p0 = por %p387_p13, %p386_p12 }
  0x1d   :  { %p389_p1 = pnand %p388_p0, %p382_p11 }
  0x1f   :  { %392 = shalt.err (!%p389_p1)
}
  0x20   :  { %21 = dma.hbm_to_vmem [thread:$0]  %s502_s0, 128, %s19_s21, [#allocation3]  }
  0x21   :  { %s421_s16 = smov [#allocation6]   ;;  %s393_s20 = scalar_lea.hbm %s505_s3, 2048 }
  0x22   :  { %s39_s17 = sshll.u32 %s421_s16, 4  ;;  %p394_p2 = scmp.ne.s32.totalorder %s505_s3, %s393_s20  ;;  %s40_s17 = int_to_ptr.vmem [resolvable:$true] %s39_s17 }
  0x23   :  { %p397_p3 = scmp.lt.u32.totalorder %s393_s20, %s505_s3 }
  0x25   :  { %p399_p4 = pnand %p397_p3, %p394_p2 }
  0x27   :  { %402 = shalt.err (!%p399_p4)
}
  0x28   :  { %s403_s26 = scalar_lea.vmem %s40_s17, 2048  ;;  %p408_p6 = scmp.lt.s32.totalorder %s40_s17, %s40_s17 }
  0x29   :  { %p404_p5 = scmp.ne.s32.totalorder %s40_s17, %s403_s26  ;;  %p409_p7 = scmp.lt.s32.totalorder %s403_s26, %s403_s26 }
  0x2b   :  { %p410_p8 = por %p409_p7, %p408_p6 }
  0x2d   :  { %p411_p9 = pnand %p410_p8, %p404_p5 }
  0x2f   :  { %414 = shalt.err (!%p411_p9)
}
  0x30   :  { %s422_s0 = smov 128   ;;  %s423_s21 = smov 8  }
  0x31   :  { %45 = dma.hbm_to_vmem [thread:$0]  %s505_s3, 2048, %s40_s17, [#allocation5], %s422_s0, %s422_s0, %s423_s21  }
  0x32   :  { %415 = dma.done.wait [#allocation3], 128  }
  0x33   :  { %416 = vsyncadd [#allocation3], 4294967168 }
  0x34   :  { %417 = dma.done.wait [#allocation5], 2176  }
  0x35   :  { %418 = vsyncadd [#allocation5], 4294965120  ;;  %v424_v0 = vmov 0.0   ;;  %vm425_vm0 = vmmov 0   ;;  %v426_v1 = vmov 0.0|0.0   ;;  %vm66_vm1 = vcmask 64512  }
  0x36   :  { %273 = vmatprep.subr.mxu0 %v424_v0  ;;  %275 = vmatprep.mubr.msk.f32.mxu0 %vm425_vm0, %v424_v0  ;;  %v58_v2 = vld [vmem:[#allocation4] sm:$0xff]  ;;  %v57_v3 = vld [vmem:[#allocation2] sm:$0xff]  ;;  %v141_v4 = vld [vmem:[#allocation6] sm:$0xff]  ;;  %vm243_vm2 = vcmask 15360  }
  0x37   :  { %313 = vmatprep.subr.bf16.mxu1 %v426_v1  ;;  %310 = vmatprep.mubr.msk.f32.mxu1 %vm425_vm0, %v424_v0  ;;  %v142_v5 = vld [vmem:[#allocation6 + $0x8] sm:$0xff]  ;;  %v143_v6 = vld [vmem:[#allocation6 + $0x10] sm:$0xff]  ;;  %v144_v7 = vld [vmem:[#allocation6 + $0x18] sm:$0xff] }
  0x38   :  { %274 = vmatpush3.msra.mxu0 %v58_v2  ;;  %v314_v8 = vpack.c.bf16 %v142_v5, %v141_v4  ;;  %v317_v9 = vpack.c.bf16 %v144_v7, %v143_v6  ;;  %v145_v10 = vld [vmem:[#allocation6 + $0x20] sm:$0xff]  ;;  %v146_v11 = vld [vmem:[#allocation6 + $0x28] sm:$0xff]  ;;  %v147_v13 = vld [vmem:[#allocation6 + $0x30] sm:$0xff] }
  0x39   :  { %276 = vmatmul.mubr.msk.f32.vlgmr.msra.gmra.mrb[0].mxu0 %vm66_vm1, %v57_v3  ;;  %v320_v12 = vpack.c.bf16 %v146_v11, %v145_v10  ;;  %v148_v14 = vld [vmem:[#allocation6 + $0x38] sm:$0xff]  ;;  %v149_v16 = vld [vmem:[#allocation6 + $0x40] sm:$0xff]  ;;  %v150_v17 = vld [vmem:[#allocation6 + $0x48] sm:$0xff] }
  0x3a   :  { %315 = vmatpush3.bf16.msra.mxu1 %v314_v8  ;;  %v323_v15 = vpack.c.bf16 %v148_v14, %v147_v13  ;;  %v326_v18 = vpack.c.bf16 %v150_v17, %v149_v16  ;;  %v151_v19 = vld [vmem:[#allocation6 + $0x50] sm:$0xff]  ;;  %v152_v20 = vld [vmem:[#allocation6 + $0x58] sm:$0xff]  ;;  %v153_v22 = vld [vmem:[#allocation6 + $0x60] sm:$0xff] }
  0x3b   :  { %316 = vmatprep.subr.bf16.mxu1 %v426_v1  ;;  %v329_v21 = vpack.c.bf16 %v152_v20, %v151_v19  ;;  %v154_v23 = vld [vmem:[#allocation6 + $0x68] sm:$0xff]  ;;  %v155_v25 = vld [vmem:[#allocation6 + $0x70] sm:$0xff]  ;;  %v156_v26 = vld [vmem:[#allocation6 + $0x78] sm:$0xff] }
  0x3c   :  { %v332_v24 = vpack.c.bf16 %v154_v23, %v153_v22  ;;  %v335_v27 = vpack.c.bf16 %v156_v26, %v155_v25  ;;  %v251_v28 = vld [vmem:[%s504_s2] ss:$0 sm:$0xff] }
  0x3d   :  { %v253_v33 = vld [vmem:[%s506_s4] ss:$0 sm:$0xff] }
  0x3e   :  { %318 = vmatpush3.bf16.msra.mxu1 %v317_v9 }
  0x3f   :  { %319 = vmatprep.subr.bf16.mxu1 %v426_v1 }
  0x42   :  { %321 = vmatpush3.bf16.msra.mxu1 %v320_v12 }
  0x43   :  { %322 = vmatprep.subr.bf16.mxu1 %v426_v1 }
  0x46   :  { %324 = vmatpush3.bf16.msra.mxu1 %v323_v15 }
  0x47   :  { %325 = vmatprep.subr.bf16.mxu1 %v426_v1 }
  0x4a   :  { %327 = vmatpush3.bf16.msra.mxu1 %v326_v18 }
  0x4b   :  { %328 = vmatprep.subr.bf16.mxu1 %v426_v1 }
  0x4e   :  { %330 = vmatpush3.bf16.msra.mxu1 %v329_v21 }
  0x4f   :  { %331 = vmatprep.subr.bf16.mxu1 %v426_v1 }
  0x52   :  { %333 = vmatpush3.bf16.msra.mxu1 %v332_v24 }
  0x53   :  { %334 = vmatprep.subr.bf16.mxu1 %v426_v1 }
  0x56   :  { %336 = vmatpush3.bf16.msra.mxu1 %v335_v27 }
 0x10c   :  { %v136_v29 = vpop.f32.mrb[0].mxu0 }
 0x10d   :  { %v137_v30 = vadd.f32 %v251_v28, %v136_v29  ;;  %v277_v31 = vpop.f32.mrb[1].mxu0 }
 0x10f   :  { %v140_v32 = vmax.f32 %v137_v30, 0.0 }
 0x111   :  { %311 = vmatmul.mubr.f32.vlgmr.msra.gmra.mrb[0].mxu1 %v140_v32 }
 0x1e4   :  { %v230_v34 = vpop.f32.mrb[0].mxu1 }
 0x1e5   :  { %v231_v35 = vadd.f32 %v253_v33, %v230_v34  ;;  %v312_v36 = vpop.f32.mrb[1].mxu1 }
 0x1e7   :  { %234 = vmax.xlane.f32.xlu0 %v231_v35 }
 0x274   :  { %v235_v37 = vpop.xlane.xlu0 %234 }
 0x275   :  { %v236_v38 = vsub.f32 %v231_v35, %v235_v37 }
 0x277   :  { %v237_v39 = vmul.f32 1.442695, %v236_v38 }
 0x279   :  { %345 = vpow2.f32 %v237_v39 }
 0x283   :  { %v346_v40 = vpop.eup %345 }
 0x284   :  { %239 = vadd.xlane.f32.xlu0 %v346_v40 }
 0x311   :  { %v240_v41 = vpop.xlane.xlu0 %239 }
 0x312   :  { %347 = vrcp.f32 %v240_v41 }
 0x31c   :  { %v348_v42 = vpop.eup %347 }
 0x31d   :  { %v242_v43 = vmul.f32 %v348_v42, %v346_v40 }
 0x31f   :  { %244 = vst.msk [vmem:[%s507_s5] sm:$0xff] %vm243_vm2, %v242_v43 }
 0x320   :  { %249 = vsyncpa [#allocation3], 1 }
 0x321   :  { %250 = vsyncpa [#allocation5], 1 }

</bundles_post_ra>
